<compile_context>
chip_gen: v6e
topology: v6e:2x2x1
jax: 0.10.0
libtpu: 0.0.40
codegen_flags: <defaults>
</compile_context>

<pallas_src>
import jax
import jax.numpy as jnp
from jax.experimental import pallas as pl
from jax.experimental.pallas import tpu as pltpu

B, C, L = 2, 4, 16            # batch, channels, sequence length
BL = B * L                    # batch folded into the lane axis
WIDTH = 3                     # conv kernel width
DIL = 2                       # dilation (same for both convs, per the module)
PAD = DIL * (WIDTH - 1) // 2  # PyTorch 'same' padding; WIDTH odd -> symmetric
EPS = 1e-5                    # nn.BatchNorm1d default eps


def resblock_kernel(x_ref, g1_ref, b1_ref, w1_ref, cb1_ref,
                    g2_ref, b2_ref, w2_ref, cb2_ref, o_ref):
    x = x_ref[...]                                             # (C, B*L) f32

    # Position of each lane within its batch segment (L is a power of two here).
    lane = jax.lax.broadcasted_iota(jnp.int32, (C, BL), 1)
    l_loc = jnp.bitwise_and(lane, L - 1)

    inv_n = 1.0 / BL

    def bn_relu(h, g_ref, b_ref):
        # Training-mode BatchNorm1d folded into per-channel scale/shift.
        s1 = jnp.sum(h, axis=1, keepdims=True)                 # (C, 1)
        s2 = jnp.sum(h * h, axis=1, keepdims=True)             # (C, 1)
        mu = s1 * inv_n
        var = s2 * inv_n - mu * mu                             # biased variance
        scale = g_ref[...] * jax.lax.rsqrt(var + EPS)          # (C, 1)
        shift = b_ref[...] - mu * scale
        return jnp.maximum(h * scale + shift, 0.0)             # fused ReLU

    def tap(h, s):
        # shifted[c, b*L + l] = h[c, b*L + (l + s)] with zeros where l+s is outside [0, L).
        if s == 0:
            return h
        if s > 0:
            shifted = jnp.concatenate(
                [h[:, s:], jnp.zeros((C, s), jnp.float32)], axis=1)
            return jnp.where(l_loc < L - s, shifted, 0.0)
        shifted = jnp.concatenate(
            [jnp.zeros((C, -s), jnp.float32), h[:, :BL + s]], axis=1)
        return jnp.where(l_loc >= -s, shifted, 0.0)

    def conv(h, w_ref, cb_ref):
        # Dilated 'same' Conv1d as WIDTH*C_in VPU broadcast-MACs over (C_out, B*L).
        w = w_ref[...]                                         # (WIDTH, C_in, C_out, B*L)
        acc = jnp.zeros((C, BL), jnp.float32)
        for k in range(WIDTH):
            t = tap(h, k * DIL - PAD)                          # (C_in, B*L)
            for i in range(C):
                acc = acc + w[k, i] * t[i:i + 1, :]
        return acc + cb_ref[...]

    h = conv(bn_relu(x, g1_ref, b1_ref), w1_ref, cb1_ref)      # bn1 -> relu -> conv1
    h = conv(bn_relu(h, g2_ref, b2_ref), w2_ref, cb2_ref)      # bn2 -> relu -> conv2
    o_ref[...] = (h + x).astype(o_ref.dtype)                   # residual add


def residual_block_v2(x, params):
    g1, b1, w1, cb1, g2, b2, w2, cb2 = params

    # Layout plumbing in the wrapper: fold batch into lanes -> (C, B*L).
    xf = jnp.transpose(x, (1, 0, 2)).reshape(C, BL).astype(jnp.float32)

    def ch(p):                               # per-channel params -> (C, 1)
        return p.reshape(C, 1).astype(jnp.float32)

    def wb(w):                               # (C_out, C_in, W) -> (W, C_in, C_out, B*L)
        wt = jnp.transpose(w, (2, 1, 0)).astype(jnp.float32)
        return jnp.broadcast_to(wt[..., None], (WIDTH, C, C, BL))

    vmem = pl.BlockSpec(memory_space=pltpu.MemorySpace.VMEM)
    # TODO(synk): if this block is applied to many (B,C,L) slabs / stacked layers, add a
    # ('parallel',) grid over slabs to amortize launch overhead and use both v7x cores.
    of = pl.pallas_call(
        resblock_kernel,
        out_shape=jax.ShapeDtypeStruct((C, BL), jnp.float32),
        in_specs=[vmem] * 9,
        out_specs=vmem,
    )(xf, ch(g1), ch(b1), wb(w1), ch(cb1), ch(g2), ch(b2), wb(w2), ch(cb2))
    return jnp.transpose(of.reshape(C, B, L), (1, 0, 2))


def ref_forward(x, params):
    """Pure-JAX reference of ResidualBlock_v2.forward (training-mode BN)."""
    g1, b1, w1, cb1, g2, b2, w2, cb2 = params

    def bn(h, g, b):
        mu = h.mean(axis=(0, 2), keepdims=True)
        var = ((h - mu) ** 2).mean(axis=(0, 2), keepdims=True)
        return (h - mu) / jnp.sqrt(var + EPS) * g.reshape(1, C, 1) + b.reshape(1, C, 1)

    def conv(h, w, cb):
        y = jax.lax.conv_general_dilated(
            h, w, window_strides=(1,), padding=[(PAD, PAD)],
            rhs_dilation=(DIL,), dimension_numbers=("NCH", "OIH", "NCH"))
        return y + cb.reshape(1, C, 1)

    h = jnp.maximum(bn(x, g1, b1), 0.0)
    h = conv(h, w1, cb1)
    h = jnp.maximum(bn(h, g2, b2), 0.0)
    h = conv(h, w2, cb2)
    return h + x


if __name__ == "__main__":
    key = jax.random.PRNGKey(0)
    ks = jax.random.split(key, 9)

    x = jax.random.normal(ks[0], (B, C, L), jnp.float32)
    # Deterministic, non-trivial parameter init (shapes per nn.BatchNorm1d / nn.Conv1d).
    g1 = 1.0 + 0.1 * jax.random.normal(ks[1], (C,), jnp.float32)
    b1 = 0.1 * jax.random.normal(ks[2], (C,), jnp.float32)
    w1 = jax.random.normal(ks[3], (C, C, WIDTH), jnp.float32) / jnp.sqrt(C * WIDTH)
    cb1 = 0.1 * jax.random.normal(ks[4], (C,), jnp.float32)
    g2 = 1.0 + 0.1 * jax.random.normal(ks[5], (C,), jnp.float32)
    b2 = 0.1 * jax.random.normal(ks[6], (C,), jnp.float32)
    w2 = jax.random.normal(ks[7], (C, C, WIDTH), jnp.float32) / jnp.sqrt(C * WIDTH)
    cb2 = 0.1 * jax.random.normal(ks[8], (C,), jnp.float32)
    params = (g1, b1, w1, cb1, g2, b2, w2, cb2)

    out = jax.block_until_ready(residual_block_v2(x, params))

    ref = ref_forward(x, params)
    assert out.shape == (B, C, L)
    assert jnp.allclose(out, ref, atol=1e-4, rtol=1e-4), "mismatch vs JAX reference"
    print("KERNEL_OK")
</pallas_src>

<mosaic_0001>
module attributes {stable_mosaic.version = 11 : i64} {
  func.func @resblock_kernel(%arg0: memref<4x32xf32, #tpu.memory_space<vmem>>, %arg1: memref<4x1xf32, #tpu.memory_space<vmem>>, %arg2: memref<4x1xf32, #tpu.memory_space<vmem>>, %arg3: memref<3x4x4x32xf32, #tpu.memory_space<vmem>>, %arg4: memref<4x1xf32, #tpu.memory_space<vmem>>, %arg5: memref<4x1xf32, #tpu.memory_space<vmem>>, %arg6: memref<4x1xf32, #tpu.memory_space<vmem>>, %arg7: memref<3x4x4x32xf32, #tpu.memory_space<vmem>>, %arg8: memref<4x1xf32, #tpu.memory_space<vmem>>, %arg9: memref<4x32xf32, #tpu.memory_space<vmem>>) attributes {dimension_semantics = [], scalar_prefetch = 0 : i64, scratch_operands = 0 : i64, tpu.core_type = #tpu.core_type<tc>} {
    %c0 = arith.constant 0 : index
    %c0_0 = arith.constant 0 : index
    %0 = vector.load %arg0[%c0, %c0_0] : memref<4x32xf32, #tpu.memory_space<vmem>>, vector<4x32xf32>
    %1 = tpu.iota {dimensions = array<i32: 1>} : vector<4x32xi32>
    %c15_i32 = arith.constant 15 : i32
    %2 = vector.broadcast %c15_i32 : i32 to vector<4x32xi32>
    %3 = arith.andi %1, %2 : vector<4x32xi32>
    %cst = arith.constant dense<0.000000e+00> : vector<4xf32>
    %4 = vector.multi_reduction <add>, %0, %cst [1] : vector<4x32xf32> to vector<4xf32>
    %5 = vector.shape_cast %4 : vector<4xf32> to vector<4x1xf32>
    %6 = arith.mulf %0, %0 : vector<4x32xf32>
    %cst_1 = arith.constant dense<0.000000e+00> : vector<4xf32>
    %7 = vector.multi_reduction <add>, %6, %cst_1 [1] : vector<4x32xf32> to vector<4xf32>
    %8 = vector.shape_cast %7 : vector<4xf32> to vector<4x1xf32>
    %cst_2 = arith.constant 3.125000e-02 : f32
    %9 = vector.broadcast %cst_2 : f32 to vector<4x1xf32>
    %10 = arith.mulf %5, %9 : vector<4x1xf32>
    %cst_3 = arith.constant 3.125000e-02 : f32
    %11 = vector.broadcast %cst_3 : f32 to vector<4x1xf32>
    %12 = arith.mulf %8, %11 : vector<4x1xf32>
    %13 = arith.mulf %10, %10 : vector<4x1xf32>
    %14 = arith.subf %12, %13 : vector<4x1xf32>
    %c0_4 = arith.constant 0 : index
    %c0_5 = arith.constant 0 : index
    %15 = vector.load %arg1[%c0_4, %c0_5] : memref<4x1xf32, #tpu.memory_space<vmem>>, vector<4x1xf32>
    %cst_6 = arith.constant 9.99999974E-6 : f32
    %16 = vector.broadcast %cst_6 : f32 to vector<4x1xf32>
    %17 = arith.addf %14, %16 : vector<4x1xf32>
    %18 = math.rsqrt %17 : vector<4x1xf32>
    %19 = arith.mulf %15, %18 : vector<4x1xf32>
    %c0_7 = arith.constant 0 : index
    %c0_8 = arith.constant 0 : index
    %20 = vector.load %arg2[%c0_7, %c0_8] : memref<4x1xf32, #tpu.memory_space<vmem>>, vector<4x1xf32>
    %21 = arith.mulf %10, %19 : vector<4x1xf32>
    %22 = arith.subf %20, %21 : vector<4x1xf32>
    %23 = vector.broadcast %19 : vector<4x1xf32> to vector<4x32xf32>
    %24 = arith.mulf %0, %23 : vector<4x32xf32>
    %25 = vector.broadcast %22 : vector<4x1xf32> to vector<4x32xf32>
    %26 = arith.addf %24, %25 : vector<4x32xf32>
    %cst_9 = arith.constant 0.000000e+00 : f32
    %27 = vector.broadcast %cst_9 : f32 to vector<4x32xf32>
    %28 = arith.maximumf %26, %27 : vector<4x32xf32>
    %c0_10 = arith.constant 0 : index
    %c0_11 = arith.constant 0 : index
    %c0_12 = arith.constant 0 : index
    %c0_13 = arith.constant 0 : index
    %29 = vector.load %arg3[%c0_10, %c0_11, %c0_12, %c0_13] : memref<3x4x4x32xf32, #tpu.memory_space<vmem>>, vector<3x4x4x32xf32>
    %cst_14 = arith.constant 0.000000e+00 : f32
    %30 = vector.broadcast %cst_14 : f32 to vector<4x32xf32>
    %cst_15 = arith.constant 0.000000e+00 : f32
    %31 = vector.broadcast %cst_15 : f32 to vector<4x2xf32>
    %32 = vector.extract_strided_slice %28 {offsets = [0, 0], sizes = [4, 30], strides = [1, 1]} : vector<4x32xf32> to vector<4x30xf32>
    %33 = tpu.concatenate %31, %32 in 1 : vector<4x2xf32>, vector<4x30xf32> -> vector<4x32xf32>
    %c2_i32 = arith.constant 2 : i32
    %34 = vector.broadcast %c2_i32 : i32 to vector<4x32xi32>
    %35 = arith.cmpi sge, %3, %34 : vector<4x32xi32>
    %cst_16 = arith.constant 0.000000e+00 : f32
    %36 = vector.broadcast %cst_16 : f32 to vector<4x32xf32>
    %37 = arith.select %35, %33, %36 : vector<4x32xi1>, vector<4x32xf32>
    %38 = vector.extract_strided_slice %29 {offsets = [0, 0, 0, 0], sizes = [1, 1, 4, 32], strides = [1, 1, 1, 1]} : vector<3x4x4x32xf32> to vector<1x1x4x32xf32>
    %39 = vector.shape_cast %38 : vector<1x1x4x32xf32> to vector<4x32xf32>
    %40 = vector.extract_strided_slice %37 {offsets = [0, 0], sizes = [1, 32], strides = [1, 1]} : vector<4x32xf32> to vector<1x32xf32>
    %41 = vector.broadcast %40 : vector<1x32xf32> to vector<4x32xf32>
    %42 = arith.mulf %39, %41 : vector<4x32xf32>
    %43 = arith.addf %30, %42 : vector<4x32xf32>
    %44 = vector.extract_strided_slice %29 {offsets = [0, 1, 0, 0], sizes = [1, 1, 4, 32], strides = [1, 1, 1, 1]} : vector<3x4x4x32xf32> to vector<1x1x4x32xf32>
    %45 = vector.shape_cast %44 : vector<1x1x4x32xf32> to vector<4x32xf32>
    %46 = vector.extract_strided_slice %37 {offsets = [1, 0], sizes = [1, 32], strides = [1, 1]} : vector<4x32xf32> to vector<1x32xf32>
    %47 = vector.broadcast %46 : vector<1x32xf32> to vector<4x32xf32>
    %48 = arith.mulf %45, %47 : vector<4x32xf32>
    %49 = arith.addf %43, %48 : vector<4x32xf32>
    %50 = vector.extract_strided_slice %29 {offsets = [0, 2, 0, 0], sizes = [1, 1, 4, 32], strides = [1, 1, 1, 1]} : vector<3x4x4x32xf32> to vector<1x1x4x32xf32>
    %51 = vector.shape_cast %50 : vector<1x1x4x32xf32> to vector<4x32xf32>
    %52 = vector.extract_strided_slice %37 {offsets = [2, 0], sizes = [1, 32], strides = [1, 1]} : vector<4x32xf32> to vector<1x32xf32>
    %53 = vector.broadcast %52 : vector<1x32xf32> to vector<4x32xf32>
    %54 = arith.mulf %51, %53 : vector<4x32xf32>
    %55 = arith.addf %49, %54 : vector<4x32xf32>
    %56 = vector.extract_strided_slice %29 {offsets = [0, 3, 0, 0], sizes = [1, 1, 4, 32], strides = [1, 1, 1, 1]} : vector<3x4x4x32xf32> to vector<1x1x4x32xf32>
    %57 = vector.shape_cast %56 : vector<1x1x4x32xf32> to vector<4x32xf32>
    %58 = vector.extract_strided_slice %37 {offsets = [3, 0], sizes = [1, 32], strides = [1, 1]} : vector<4x32xf32> to vector<1x32xf32>
    %59 = vector.broadcast %58 : vector<1x32xf32> to vector<4x32xf32>
    %60 = arith.mulf %57, %59 : vector<4x32xf32>
    %61 = arith.addf %55, %60 : vector<4x32xf32>
    %62 = vector.extract_strided_slice %29 {offsets = [1, 0, 0, 0], sizes = [1, 1, 4, 32], strides = [1, 1, 1, 1]} : vector<3x4x4x32xf32> to vector<1x1x4x32xf32>
    %63 = vector.shape_cast %62 : vector<1x1x4x32xf32> to vector<4x32xf32>
    %64 = vector.extract_strided_slice %28 {offsets = [0, 0], sizes = [1, 32], strides = [1, 1]} : vector<4x32xf32> to vector<1x32xf32>
    %65 = vector.broadcast %64 : vector<1x32xf32> to vector<4x32xf32>
    %66 = arith.mulf %63, %65 : vector<4x32xf32>
    %67 = arith.addf %61, %66 : vector<4x32xf32>
    %68 = vector.extract_strided_slice %29 {offsets = [1, 1, 0, 0], sizes = [1, 1, 4, 32], strides = [1, 1, 1, 1]} : vector<3x4x4x32xf32> to vector<1x1x4x32xf32>
    %69 = vector.shape_cast %68 : vector<1x1x4x32xf32> to vector<4x32xf32>
    %70 = vector.extract_strided_slice %28 {offsets = [1, 0], sizes = [1, 32], strides = [1, 1]} : vector<4x32xf32> to vector<1x32xf32>
    %71 = vector.broadcast %70 : vector<1x32xf32> to vector<4x32xf32>
    %72 = arith.mulf %69, %71 : vector<4x32xf32>
    %73 = arith.addf %67, %72 : vector<4x32xf32>
    %74 = vector.extract_strided_slice %29 {offsets = [1, 2, 0, 0], sizes = [1, 1, 4, 32], strides = [1, 1, 1, 1]} : vector<3x4x4x32xf32> to vector<1x1x4x32xf32>
    %75 = vector.shape_cast %74 : vector<1x1x4x32xf32> to vector<4x32xf32>
    %76 = vector.extract_strided_slice %28 {offsets = [2, 0], sizes = [1, 32], strides = [1, 1]} : vector<4x32xf32> to vector<1x32xf32>
    %77 = vector.broadcast %76 : vector<1x32xf32> to vector<4x32xf32>
    %78 = arith.mulf %75, %77 : vector<4x32xf32>
    %79 = arith.addf %73, %78 : vector<4x32xf32>
    %80 = vector.extract_strided_slice %29 {offsets = [1, 3, 0, 0], sizes = [1, 1, 4, 32], strides = [1, 1, 1, 1]} : vector<3x4x4x32xf32> to vector<1x1x4x32xf32>
    %81 = vector.shape_cast %80 : vector<1x1x4x32xf32> to vector<4x32xf32>
    %82 = vector.extract_strided_slice %28 {offsets = [3, 0], sizes = [1, 32], strides = [1, 1]} : vector<4x32xf32> to vector<1x32xf32>
    %83 = vector.broadcast %82 : vector<1x32xf32> to vector<4x32xf32>
    %84 = arith.mulf %81, %83 : vector<4x32xf32>
    %85 = arith.addf %79, %84 : vector<4x32xf32>
    %86 = vector.extract_strided_slice %28 {offsets = [0, 2], sizes = [4, 30], strides = [1, 1]} : vector<4x32xf32> to vector<4x30xf32>
    %cst_17 = arith.constant 0.000000e+00 : f32
    %87 = vector.broadcast %cst_17 : f32 to vector<4x2xf32>
    %88 = tpu.concatenate %86, %87 in 1 : vector<4x30xf32>, vector<4x2xf32> -> vector<4x32xf32>
    %c14_i32 = arith.constant 14 : i32
    %89 = vector.broadcast %c14_i32 : i32 to vector<4x32xi32>
    %90 = arith.cmpi slt, %3, %89 : vector<4x32xi32>
    %cst_18 = arith.constant 0.000000e+00 : f32
    %91 = vector.broadcast %cst_18 : f32 to vector<4x32xf32>
    %92 = arith.select %90, %88, %91 : vector<4x32xi1>, vector<4x32xf32>
    %93 = vector.extract_strided_slice %29 {offsets = [2, 0, 0, 0], sizes = [1, 1, 4, 32], strides = [1, 1, 1, 1]} : vector<3x4x4x32xf32> to vector<1x1x4x32xf32>
    %94 = vector.shape_cast %93 : vector<1x1x4x32xf32> to vector<4x32xf32>
    %95 = vector.extract_strided_slice %92 {offsets = [0, 0], sizes = [1, 32], strides = [1, 1]} : vector<4x32xf32> to vector<1x32xf32>
    %96 = vector.broadcast %95 : vector<1x32xf32> to vector<4x32xf32>
    %97 = arith.mulf %94, %96 : vector<4x32xf32>
    %98 = arith.addf %85, %97 : vector<4x32xf32>
    %99 = vector.extract_strided_slice %29 {offsets = [2, 1, 0, 0], sizes = [1, 1, 4, 32], strides = [1, 1, 1, 1]} : vector<3x4x4x32xf32> to vector<1x1x4x32xf32>
    %100 = vector.shape_cast %99 : vector<1x1x4x32xf32> to vector<4x32xf32>
    %101 = vector.extract_strided_slice %92 {offsets = [1, 0], sizes = [1, 32], strides = [1, 1]} : vector<4x32xf32> to vector<1x32xf32>
    %102 = vector.broadcast %101 : vector<1x32xf32> to vector<4x32xf32>
    %103 = arith.mulf %100, %102 : vector<4x32xf32>
    %104 = arith.addf %98, %103 : vector<4x32xf32>
    %105 = vector.extract_strided_slice %29 {offsets = [2, 2, 0, 0], sizes = [1, 1, 4, 32], strides = [1, 1, 1, 1]} : vector<3x4x4x32xf32> to vector<1x1x4x32xf32>
    %106 = vector.shape_cast %105 : vector<1x1x4x32xf32> to vector<4x32xf32>
    %107 = vector.extract_strided_slice %92 {offsets = [2, 0], sizes = [1, 32], strides = [1, 1]} : vector<4x32xf32> to vector<1x32xf32>
    %108 = vector.broadcast %107 : vector<1x32xf32> to vector<4x32xf32>
    %109 = arith.mulf %106, %108 : vector<4x32xf32>
    %110 = arith.addf %104, %109 : vector<4x32xf32>
    %111 = vector.extract_strided_slice %29 {offsets = [2, 3, 0, 0], sizes = [1, 1, 4, 32], strides = [1, 1, 1, 1]} : vector<3x4x4x32xf32> to vector<1x1x4x32xf32>
    %112 = vector.shape_cast %111 : vector<1x1x4x32xf32> to vector<4x32xf32>
    %113 = vector.extract_strided_slice %92 {offsets = [3, 0], sizes = [1, 32], strides = [1, 1]} : vector<4x32xf32> to vector<1x32xf32>
    %114 = vector.broadcast %113 : vector<1x32xf32> to vector<4x32xf32>
    %115 = arith.mulf %112, %114 : vector<4x32xf32>
    %116 = arith.addf %110, %115 : vector<4x32xf32>
    %c0_19 = arith.constant 0 : index
    %c0_20 = arith.constant 0 : index
    %117 = vector.load %arg4[%c0_19, %c0_20] : memref<4x1xf32, #tpu.memory_space<vmem>>, vector<4x1xf32>
    %118 = vector.broadcast %117 : vector<4x1xf32> to vector<4x32xf32>
    %119 = arith.addf %116, %118 : vector<4x32xf32>
    %cst_21 = arith.constant dense<0.000000e+00> : vector<4xf32>
    %120 = vector.multi_reduction <add>, %119, %cst_21 [1] : vector<4x32xf32> to vector<4xf32>
    %121 = vector.shape_cast %120 : vector<4xf32> to vector<4x1xf32>
    %122 = arith.mulf %119, %119 : vector<4x32xf32>
    %cst_22 = arith.constant dense<0.000000e+00> : vector<4xf32>
    %123 = vector.multi_reduction <add>, %122, %cst_22 [1] : vector<4x32xf32> to vector<4xf32>
    %124 = vector.shape_cast %123 : vector<4xf32> to vector<4x1xf32>
    %cst_23 = arith.constant 3.125000e-02 : f32
    %125 = vector.broadcast %cst_23 : f32 to vector<4x1xf32>
    %126 = arith.mulf %121, %125 : vector<4x1xf32>
    %cst_24 = arith.constant 3.125000e-02 : f32
    %127 = vector.broadcast %cst_24 : f32 to vector<4x1xf32>
    %128 = arith.mulf %124, %127 : vector<4x1xf32>
    %129 = arith.mulf %126, %126 : vector<4x1xf32>
    %130 = arith.subf %128, %129 : vector<4x1xf32>
    %c0_25 = arith.constant 0 : index
    %c0_26 = arith.constant 0 : index
    %131 = vector.load %arg5[%c0_25, %c0_26] : memref<4x1xf32, #tpu.memory_space<vmem>>, vector<4x1xf32>
    %cst_27 = arith.constant 9.99999974E-6 : f32
    %132 = vector.broadcast %cst_27 : f32 to vector<4x1xf32>
    %133 = arith.addf %130, %132 : vector<4x1xf32>
    %134 = math.rsqrt %133 : vector<4x1xf32>
    %135 = arith.mulf %131, %134 : vector<4x1xf32>
    %c0_28 = arith.constant 0 : index
    %c0_29 = arith.constant 0 : index
    %136 = vector.load %arg6[%c0_28, %c0_29] : memref<4x1xf32, #tpu.memory_space<vmem>>, vector<4x1xf32>
    %137 = arith.mulf %126, %135 : vector<4x1xf32>
    %138 = arith.subf %136, %137 : vector<4x1xf32>
    %139 = vector.broadcast %135 : vector<4x1xf32> to vector<4x32xf32>
    %140 = arith.mulf %119, %139 : vector<4x32xf32>
    %141 = vector.broadcast %138 : vector<4x1xf32> to vector<4x32xf32>
    %142 = arith.addf %140, %141 : vector<4x32xf32>
    %cst_30 = arith.constant 0.000000e+00 : f32
    %143 = vector.broadcast %cst_30 : f32 to vector<4x32xf32>
    %144 = arith.maximumf %142, %143 : vector<4x32xf32>
    %c0_31 = arith.constant 0 : index
    %c0_32 = arith.constant 0 : index
    %c0_33 = arith.constant 0 : index
    %c0_34 = arith.constant 0 : index
    %145 = vector.load %arg7[%c0_31, %c0_32, %c0_33, %c0_34] : memref<3x4x4x32xf32, #tpu.memory_space<vmem>>, vector<3x4x4x32xf32>
    %cst_35 = arith.constant 0.000000e+00 : f32
    %146 = vector.broadcast %cst_35 : f32 to vector<4x32xf32>
    %cst_36 = arith.constant 0.000000e+00 : f32
    %147 = vector.broadcast %cst_36 : f32 to vector<4x2xf32>
    %148 = vector.extract_strided_slice %144 {offsets = [0, 0], sizes = [4, 30], strides = [1, 1]} : vector<4x32xf32> to vector<4x30xf32>
    %149 = tpu.concatenate %147, %148 in 1 : vector<4x2xf32>, vector<4x30xf32> -> vector<4x32xf32>
    %c2_i32_37 = arith.constant 2 : i32
    %150 = vector.broadcast %c2_i32_37 : i32 to vector<4x32xi32>
    %151 = arith.cmpi sge, %3, %150 : vector<4x32xi32>
    %cst_38 = arith.constant 0.000000e+00 : f32
    %152 = vector.broadcast %cst_38 : f32 to vector<4x32xf32>
    %153 = arith.select %151, %149, %152 : vector<4x32xi1>, vector<4x32xf32>
    %154 = vector.extract_strided_slice %145 {offsets = [0, 0, 0, 0], sizes = [1, 1, 4, 32], strides = [1, 1, 1, 1]} : vector<3x4x4x32xf32> to vector<1x1x4x32xf32>
    %155 = vector.shape_cast %154 : vector<1x1x4x32xf32> to vector<4x32xf32>
    %156 = vector.extract_strided_slice %153 {offsets = [0, 0], sizes = [1, 32], strides = [1, 1]} : vector<4x32xf32> to vector<1x32xf32>
    %157 = vector.broadcast %156 : vector<1x32xf32> to vector<4x32xf32>
    %158 = arith.mulf %155, %157 : vector<4x32xf32>
    %159 = arith.addf %146, %158 : vector<4x32xf32>
    %160 = vector.extract_strided_slice %145 {offsets = [0, 1, 0, 0], sizes = [1, 1, 4, 32], strides = [1, 1, 1, 1]} : vector<3x4x4x32xf32> to vector<1x1x4x32xf32>
    %161 = vector.shape_cast %160 : vector<1x1x4x32xf32> to vector<4x32xf32>
    %162 = vector.extract_strided_slice %153 {offsets = [1, 0], sizes = [1, 32], strides = [1, 1]} : vector<4x32xf32> to vector<1x32xf32>
    %163 = vector.broadcast %162 : vector<1x32xf32> to vector<4x32xf32>
    %164 = arith.mulf %161, %163 : vector<4x32xf32>
    %165 = arith.addf %159, %164 : vector<4x32xf32>
    %166 = vector.extract_strided_slice %145 {offsets = [0, 2, 0, 0], sizes = [1, 1, 4, 32], strides = [1, 1, 1, 1]} : vector<3x4x4x32xf32> to vector<1x1x4x32xf32>
    %167 = vector.shape_cast %166 : vector<1x1x4x32xf32> to vector<4x32xf32>
    %168 = vector.extract_strided_slice %153 {offsets = [2, 0], sizes = [1, 32], strides = [1, 1]} : vector<4x32xf32> to vector<1x32xf32>
    %169 = vector.broadcast %168 : vector<1x32xf32> to vector<4x32xf32>
    %170 = arith.mulf %167, %169 : vector<4x32xf32>
    %171 = arith.addf %165, %170 : vector<4x32xf32>
    %172 = vector.extract_strided_slice %145 {offsets = [0, 3, 0, 0], sizes = [1, 1, 4, 32], strides = [1, 1, 1, 1]} : vector<3x4x4x32xf32> to vector<1x1x4x32xf32>
    %173 = vector.shape_cast %172 : vector<1x1x4x32xf32> to vector<4x32xf32>
    %174 = vector.extract_strided_slice %153 {offsets = [3, 0], sizes = [1, 32], strides = [1, 1]} : vector<4x32xf32> to vector<1x32xf32>
    %175 = vector.broadcast %174 : vector<1x32xf32> to vector<4x32xf32>
    %176 = arith.mulf %173, %175 : vector<4x32xf32>
    %177 = arith.addf %171, %176 : vector<4x32xf32>
    %178 = vector.extract_strided_slice %145 {offsets = [1, 0, 0, 0], sizes = [1, 1, 4, 32], strides = [1, 1, 1, 1]} : vector<3x4x4x32xf32> to vector<1x1x4x32xf32>
    %179 = vector.shape_cast %178 : vector<1x1x4x32xf32> to vector<4x32xf32>
    %180 = vector.extract_strided_slice %144 {offsets = [0, 0], sizes = [1, 32], strides = [1, 1]} : vector<4x32xf32> to vector<1x32xf32>
    %181 = vector.broadcast %180 : vector<1x32xf32> to vector<4x32xf32>
    %182 = arith.mulf %179, %181 : vector<4x32xf32>
    %183 = arith.addf %177, %182 : vector<4x32xf32>
    %184 = vector.extract_strided_slice %145 {offsets = [1, 1, 0, 0], sizes = [1, 1, 4, 32], strides = [1, 1, 1, 1]} : vector<3x4x4x32xf32> to vector<1x1x4x32xf32>
    %185 = vector.shape_cast %184 : vector<1x1x4x32xf32> to vector<4x32xf32>
    %186 = vector.extract_strided_slice %144 {offsets = [1, 0], sizes = [1, 32], strides = [1, 1]} : vector<4x32xf32> to vector<1x32xf32>
    %187 = vector.broadcast %186 : vector<1x32xf32> to vector<4x32xf32>
    %188 = arith.mulf %185, %187 : vector<4x32xf32>
    %189 = arith.addf %183, %188 : vector<4x32xf32>
    %190 = vector.extract_strided_slice %145 {offsets = [1, 2, 0, 0], sizes = [1, 1, 4, 32], strides = [1, 1, 1, 1]} : vector<3x4x4x32xf32> to vector<1x1x4x32xf32>
    %191 = vector.shape_cast %190 : vector<1x1x4x32xf32> to vector<4x32xf32>
    %192 = vector.extract_strided_slice %144 {offsets = [2, 0], sizes = [1, 32], strides = [1, 1]} : vector<4x32xf32> to vector<1x32xf32>
    %193 = vector.broadcast %192 : vector<1x32xf32> to vector<4x32xf32>
    %194 = arith.mulf %191, %193 : vector<4x32xf32>
    %195 = arith.addf %189, %194 : vector<4x32xf32>
    %196 = vector.extract_strided_slice %145 {offsets = [1, 3, 0, 0], sizes = [1, 1, 4, 32], strides = [1, 1, 1, 1]} : vector<3x4x4x32xf32> to vector<1x1x4x32xf32>
    %197 = vector.shape_cast %196 : vector<1x1x4x32xf32> to vector<4x32xf32>
    %198 = vector.extract_strided_slice %144 {offsets = [3, 0], sizes = [1, 32], strides = [1, 1]} : vector<4x32xf32> to vector<1x32xf32>
    %199 = vector.broadcast %198 : vector<1x32xf32> to vector<4x32xf32>
    %200 = arith.mulf %197, %199 : vector<4x32xf32>
    %201 = arith.addf %195, %200 : vector<4x32xf32>
    %202 = vector.extract_strided_slice %144 {offsets = [0, 2], sizes = [4, 30], strides = [1, 1]} : vector<4x32xf32> to vector<4x30xf32>
    %cst_39 = arith.constant 0.000000e+00 : f32
    %203 = vector.broadcast %cst_39 : f32 to vector<4x2xf32>
    %204 = tpu.concatenate %202, %203 in 1 : vector<4x30xf32>, vector<4x2xf32> -> vector<4x32xf32>
    %c14_i32_40 = arith.constant 14 : i32
    %205 = vector.broadcast %c14_i32_40 : i32 to vector<4x32xi32>
    %206 = arith.cmpi slt, %3, %205 : vector<4x32xi32>
    %cst_41 = arith.constant 0.000000e+00 : f32
    %207 = vector.broadcast %cst_41 : f32 to vector<4x32xf32>
    %208 = arith.select %206, %204, %207 : vector<4x32xi1>, vector<4x32xf32>
    %209 = vector.extract_strided_slice %145 {offsets = [2, 0, 0, 0], sizes = [1, 1, 4, 32], strides = [1, 1, 1, 1]} : vector<3x4x4x32xf32> to vector<1x1x4x32xf32>
    %210 = vector.shape_cast %209 : vector<1x1x4x32xf32> to vector<4x32xf32>
    %211 = vector.extract_strided_slice %208 {offsets = [0, 0], sizes = [1, 32], strides = [1, 1]} : vector<4x32xf32> to vector<1x32xf32>
    %212 = vector.broadcast %211 : vector<1x32xf32> to vector<4x32xf32>
    %213 = arith.mulf %210, %212 : vector<4x32xf32>
    %214 = arith.addf %201, %213 : vector<4x32xf32>
    %215 = vector.extract_strided_slice %145 {offsets = [2, 1, 0, 0], sizes = [1, 1, 4, 32], strides = [1, 1, 1, 1]} : vector<3x4x4x32xf32> to vector<1x1x4x32xf32>
    %216 = vector.shape_cast %215 : vector<1x1x4x32xf32> to vector<4x32xf32>
    %217 = vector.extract_strided_slice %208 {offsets = [1, 0], sizes = [1, 32], strides = [1, 1]} : vector<4x32xf32> to vector<1x32xf32>
    %218 = vector.broadcast %217 : vector<1x32xf32> to vector<4x32xf32>
    %219 = arith.mulf %216, %218 : vector<4x32xf32>
    %220 = arith.addf %214, %219 : vector<4x32xf32>
    %221 = vector.extract_strided_slice %145 {offsets = [2, 2, 0, 0], sizes = [1, 1, 4, 32], strides = [1, 1, 1, 1]} : vector<3x4x4x32xf32> to vector<1x1x4x32xf32>
    %222 = vector.shape_cast %221 : vector<1x1x4x32xf32> to vector<4x32xf32>
    %223 = vector.extract_strided_slice %208 {offsets = [2, 0], sizes = [1, 32], strides = [1, 1]} : vector<4x32xf32> to vector<1x32xf32>
    %224 = vector.broadcast %223 : vector<1x32xf32> to vector<4x32xf32>
    %225 = arith.mulf %222, %224 : vector<4x32xf32>
    %226 = arith.addf %220, %225 : vector<4x32xf32>
    %227 = vector.extract_strided_slice %145 {offsets = [2, 3, 0, 0], sizes = [1, 1, 4, 32], strides = [1, 1, 1, 1]} : vector<3x4x4x32xf32> to vector<1x1x4x32xf32>
    %228 = vector.shape_cast %227 : vector<1x1x4x32xf32> to vector<4x32xf32>
    %229 = vector.extract_strided_slice %208 {offsets = [3, 0], sizes = [1, 32], strides = [1, 1]} : vector<4x32xf32> to vector<1x32xf32>
    %230 = vector.broadcast %229 : vector<1x32xf32> to vector<4x32xf32>
    %231 = arith.mulf %228, %230 : vector<4x32xf32>
    %232 = arith.addf %226, %231 : vector<4x32xf32>
    %c0_42 = arith.constant 0 : index
    %c0_43 = arith.constant 0 : index
    %233 = vector.load %arg8[%c0_42, %c0_43] : memref<4x1xf32, #tpu.memory_space<vmem>>, vector<4x1xf32>
    %234 = vector.broadcast %233 : vector<4x1xf32> to vector<4x32xf32>
    %235 = arith.addf %232, %234 : vector<4x32xf32>
    %236 = arith.addf %235, %0 : vector<4x32xf32>
    %c0_44 = arith.constant 0 : index
    %c0_45 = arith.constant 0 : index
    %237 = vector.load %arg9[%c0_44, %c0_45] : memref<4x32xf32, #tpu.memory_space<vmem>>, vector<4x32xf32>
    tpu.vector_store %arg9[%c0_44, %c0_45], %236 {strides = array<i32>} : memref<4x32xf32, #tpu.memory_space<vmem>>, vector<4x32xf32>,
    return
  }
}

</mosaic_0001>

<bundles_post_ra>
// kernel: tpu_custom_call.1
= control target key start
LH: loop header
LB: loop body
LE: loop exit
PB: predicated region body
PF: predicated region fallthrough
CT: control target
= control target key end

     0   :  { %14 = vsyncpa [#allocation3], 0  ;;  %s590_s0 = inlined_call_operand.vmem [shape: f32[4,32], index: 0, kind: input, shape index: {}]   ;;  %s591_s1 = inlined_call_operand.vmem [shape: f32[4,1], index: 1, kind: input, shape index: {}]   ;;  %s592_s2 = inlined_call_operand.vmem [shape: f32[4,1], index: 2, kind: input, shape index: {}]   ;;  %s593_s3 = inlined_call_operand.hbm [shape: f32[3,4,4,32], index: 3, kind: input, shape index: {}]   ;;  %s594_s4 = inlined_call_operand.vmem [shape: f32[4,1], index: 4, kind: input, shape index: {}]   ;;  %s595_s5 = inlined_call_operand.vmem [shape: f32[4,1], index: 5, kind: input, shape index: {}]   ;;  %s596_s6 = inlined_call_operand.vmem [shape: f32[4,1], index: 6, kind: input, shape index: {}]   ;;  %s597_s7 = inlined_call_operand.hbm [shape: f32[3,4,4,32], index: 7, kind: input, shape index: {}]   ;;  %s598_s8 = inlined_call_operand.vmem [shape: f32[4,1], index: 8, kind: input, shape index: {}]   ;;  %s599_s9 = inlined_call_operand.hbm [shape: f32[4,32], index: 9, kind: output, shape index: {}]  }
   0x1   :  { %15 = vsyncpa [#allocation6], 0 }
   0x2   :  { %16 = vsyncpa [#allocation4], 0  ;;  %s434_s30 = smov [#allocation2]  }
   0x3   :  { %s28_s10 = sshll.u32 %s434_s30, 4  ;;  %s29_s10 = int_to_ptr.vmem [resolvable:$true] %s28_s10 }
   0x4   :  { %s376_s11 = scalar_lea.vmem %s29_s10, 768  ;;  %p381_p1 = scmp.lt.s32.totalorder %s29_s10, %s29_s10 }
   0x5   :  { %p377_p0 = scmp.ne.s32.totalorder %s29_s10, %s376_s11  ;;  %p382_p2 = scmp.lt.s32.totalorder %s376_s11, %s376_s11 }
   0x7   :  { %p383_p3 = por %p382_p2, %p381_p1 }
   0x9   :  { %p384_p4 = pnand %p383_p3, %p377_p0 }
   0xb   :  { %387 = shalt.err (!%p384_p4)
}
   0xc   :  { %s435_s12 = smov 64   ;;  %s436_s13 = smov 4  }
   0xd   :  { %34 = dma.hbm_to_vmem [thread:$0]  %s593_s3, 768, %s29_s10, [#allocation3], %s435_s12, %s435_s12, %s436_s13  }
   0xe   :  { %s437_s16 = smov [#allocation5]  }
   0xf   :  { %s46_s17 = sshll.u32 %s437_s16, 4  ;;  %s47_s17 = int_to_ptr.vmem [resolvable:$true] %s46_s17 }
  0x10   :  { %s396_s18 = scalar_lea.vmem %s47_s17, 768  ;;  %p401_p6 = scmp.lt.s32.totalorder %s47_s17, %s47_s17 }
  0x11   :  { %p397_p5 = scmp.ne.s32.totalorder %s47_s17, %s396_s18  ;;  %p402_p7 = scmp.lt.s32.totalorder %s396_s18, %s396_s18 }
  0x13   :  { %p403_p8 = por %p402_p7, %p401_p6 }
  0x15   :  { %p404_p9 = pnand %p403_p8, %p397_p5 }
  0x17   :  { %407 = shalt.err (!%p404_p9)
}
  0x18   :  { %52 = dma.hbm_to_vmem [thread:$0]  %s597_s7, 768, %s47_s17, [#allocation6], %s435_s12, %s435_s12, %s436_s13  }
  0x19   :  { %428 = dma.done.wait [#allocation3], 768  }
  0x1a   :  { %429 = vsyncadd [#allocation3], 4294966528 }
  0x1b   :  { %430 = dma.done.wait [#allocation6], 768  }
  0x1c   :  { %431 = vsyncadd [#allocation6], 4294966528  ;;  %vm65_vm0 = vcmask 257024   ;;  %v501_v0 = vld [vmem:[%s590_s0] sm:$0xf]  ;;  %v438_v4 = vmov 0   ;;  %v62_v24 = vlaneseq }
  0x1d   :  { %v66_v1 = vsel %vm65_vm0, %v501_v0, 0.0  ;;  %v69_v2 = vmul.f32 %v501_v0, %v501_v0  ;;  %362 = vset.pattern.permute.xlu1 %v438_v4  ;;  %363 = vset.pattern.permute.xlu0 %v438_v4  ;;  %v77_v12 = vld [vmem:[%s591_s1] sm:$0xf]  ;;  %s439_s24 = smov 126   ;;  %s440_s1 = smov 2   ;;  %vm113_vm1 = vcmask 15360  }
  0x1e   :  { %67 = vadd.xlane.f32.xlu0 %v66_v1  ;;  %v81_v15 = vld [vmem:[%s592_s2] sm:$0xf]  ;;  %v63_v25 = vand.u32 127, %v62_v24  ;;  %v118_v27 = vshrl.u32 %v62_v24, 7  ;;  %v98_v36 = vld [vmem:[#allocation2 + $0x4] sm:$0xf] }
  0x1f   :  { %v70_v3 = vsel %vm65_vm0, %v69_v2, 0.0  ;;  %v196_v23 = vld [vmem:[%s594_s4] sm:$0xf]  ;;  %v99_v41 = vld [vmem:[#allocation2 + $0x8] sm:$0xf]  ;;  %vm168_vm3 = vcmask 244736  }
  0x20   :  { %v64_v26 = vand.u32 15, %v63_v25  ;;  %v525_v31 = vsub.s32 0, %v118_v27  ;;  %v527_v32 = vsub.s32 1, %v118_v27  ;;  %v529_v33 = vsub.s32 2, %v118_v27  ;;  %v97_v35 = vld [vmem:[#allocation2] sm:$0xf] }
  0x21   :  { %v533_v37 = vsub.s32 3, %v118_v27  ;;  %v100_v46 = vld [vmem:[#allocation2 + $0xc] sm:$0xf]  ;;  %v101_v51 = vld [vmem:[#allocation2 + $0x10] sm:$0xf] }
  0x22   :  { %71 = vadd.xlane.f32.xlu0 %v70_v3  ;;  %vm520_vm2 = vcmp.ge.s32.totalorder %v64_v26, 2  ;;  %vm540_vm4 = vcmp.lt.s32.totalorder %v64_v26, 14  ;;  %v102_v56 = vld [vmem:[#allocation2 + $0x14] sm:$0xf]  ;;  %v103_v61 = vld [vmem:[#allocation2 + $0x18] sm:$0xf] }
  0x23   :  { %v104_v2 = vld [vmem:[#allocation2 + $0x1c] sm:$0xf] }
  0xa7   :  { %v68_v5 = vpop.xlane.xlu0 %67 }
  0xa8   :  { %v73_v6 = vmul.f32 0.03125, %v68_v5 }
  0xaa   :  { %v75_v8 = vmul.f32 %v73_v6, %v73_v6 }
  0xab   :  { %v72_v7 = vpop.xlane.xlu0 %71 }
  0xac   :  { %v74_v9 = vmul.f32 0.03125, %v72_v7 }
  0xae   :  { %v76_v10 = vsub.f32 %v74_v9, %v75_v8 }
  0xb0   :  { %v78_v11 = vadd.f32 1e-05, %v76_v10  ;;  %v106_v10 = vld [vmem:[#allocation2 + $0x24] sm:$0xf] }
  0xb2   :  { %364 = vrsqrt.f32 %v78_v11 }
  0xbf   :  { %v365_v13 = vpop.eup %364 }
  0xc0   :  { %v80_v14 = vmul.f32 %v365_v13, %v77_v12 }
  0xc2   :  { %86 = vperm.xlu1 %362, %v80_v14   ;;  %v82_v16 = vmul.f32 %v80_v14, %v73_v6  ;;  %v105_v6 = vld [vmem:[#allocation2 + $0x20] sm:$0xf]  ;;  %v107_v14 = vld [vmem:[#allocation2 + $0x28] sm:$0xf] }
  0xc4   :  { %v83_v17 = vsub.f32 %v81_v15, %v82_v16 }
  0xc6   :  { %92 = vperm.xlu1 %362, %v83_v17  }
 0x13d   :  { %v87_v18 = vpop.permute.xlu1 %86 }
 0x13e   :  { %v89_v19 = vmul.f32 %v87_v18, %v501_v0  ;;  %v108_v18 = vld [vmem:[#allocation2 + $0x2c] sm:$0xf] }
 0x141   :  { %v93_v20 = vpop.permute.xlu1 %92 }
 0x142   :  { %v95_v21 = vadd.f32 %v93_v20, %v89_v19 }
 0x144   :  { %v96_v22 = vmax.f32 %v95_v21, 0.0 }
 0x146   :  { %165 = vrot.lane.b32.xlu1 %v96_v22, %s439_s24  ;;  %110 = vrot.lane.b32.xlu0 %v96_v22, %s440_s1  ;;  %v144_v49 = vrot.slane %v96_v22, %v525_v31  ;;  %v150_v55 = vrot.slane %v96_v22, %v527_v32  ;;  %v156_v59 = vrot.slane %v96_v22, %v529_v33 }
 0x147   :  { %v162_v1 = vrot.slane %v96_v22, %v533_v37 }
 0x148   :  { %v145_v58 = vmul.f32 %v144_v49, %v101_v51  ;;  %v151_v63 = vmul.f32 %v150_v55, %v102_v56  ;;  %v157_v5 = vmul.f32 %v156_v59, %v103_v61  ;;  %v234_v56 = vld [vmem:[#allocation5] sm:$0xf] }
 0x149   :  { %v163_v9 = vmul.f32 %v162_v1, %v104_v2 }
 0x14a   :  { %199 = vperm.xlu1 %362, %v196_v23  }
 0x1b8   :  { %v111_v29 = vpop.permute.xlu0 %110  ;;  %v166_v45 = vpop.permute.xlu1 %165 }
 0x1b9   :  { %v114_v30 = vsel %vm113_vm1, 0.0, %v111_v29  ;;  %v169_v52 = vsel %vm168_vm3, %v166_v45, 0.0 }
 0x1ba   :  { %v116_v34 = vsel %vm520_vm2, %v114_v30, 0.0  ;;  %v171_v60 = vsel %vm540_vm4, %v169_v52, 0.0 }
 0x1bb   :  { %v120_v38 = vrot.slane %v116_v34, %v525_v31  ;;  %v126_v39 = vrot.slane %v116_v34, %v527_v32  ;;  %v132_v40 = vrot.slane %v116_v34, %v529_v33  ;;  %v138_v44 = vrot.slane %v116_v34, %v533_v37 }
 0x1bc   :  { %v175_v3 = vrot.slane %v171_v60, %v525_v31  ;;  %v181_v7 = vrot.slane %v171_v60, %v527_v32  ;;  %v187_v12 = vrot.slane %v171_v60, %v529_v33  ;;  %v193_v16 = vrot.slane %v171_v60, %v533_v37 }
 0x1bd   :  { %v121_v42 = vmul.f32 %v120_v38, %v97_v35  ;;  %v127_v43 = vmul.f32 %v126_v39, %v98_v36  ;;  %v133_v48 = vmul.f32 %v132_v40, %v99_v41  ;;  %v139_v54 = vmul.f32 %v138_v44, %v100_v46  ;;  %v214_v41 = vld [vmem:[%s595_s5] sm:$0xf] }
 0x1be   :  { %v176_v11 = vmul.f32 %v175_v3, %v105_v6  ;;  %v182_v15 = vmul.f32 %v181_v7, %v106_v10  ;;  %v188_v19 = vmul.f32 %v187_v12, %v107_v14  ;;  %v194_v21 = vmul.f32 %v193_v16, %v108_v18  ;;  %v218_v44 = vld [vmem:[%s596_s6] sm:$0xf]  ;;  %v237_v3 = vld [vmem:[#allocation5 + $0xc] sm:$0xf]  ;;  %v239_v12 = vld [vmem:[#allocation5 + $0x14] sm:$0xf] }
 0x1bf   :  { %v128_v47 = vadd.f32 %v127_v43, %v121_v42  ;;  %s441_s6 = smov [#allocation7]  }
 0x1c1   :  { %v134_v53 = vadd.f32 %v133_v48, %v128_v47 }
 0x1c3   :  { %v140_v57 = vadd.f32 %v139_v54, %v134_v53  ;;  %v329_v53 = vld [vmem:[%s598_s8] sm:$0xf]  ;;  %s344_s8 = sshll.u32 %s441_s6, 4  ;;  %s345_s8 = int_to_ptr.vmem [resolvable:$true] %s344_s8 }
 0x1c4   :  { %s408_s30 = scalar_lea.vmem %s345_s8, 64  ;;  %p413_p11 = scmp.lt.s32.totalorder %s345_s8, %s345_s8 }
 0x1c5   :  { %v146_v62 = vadd.f32 %v145_v58, %v140_v57  ;;  %v200_v24 = vpop.permute.xlu1 %199  ;;  %v235_v57 = vld [vmem:[#allocation5 + $0x4] sm:$0xf]  ;;  %p409_p10 = scmp.ne.s32.totalorder %s345_s8, %s408_s30  ;;  %p414_p12 = scmp.lt.s32.totalorder %s408_s30, %s408_s30 }
 0x1c7   :  { %v152_v4 = vadd.f32 %v151_v63, %v146_v62  ;;  %v236_v62 = vld [vmem:[#allocation5 + $0x8] sm:$0xf]  ;;  %p415_p13 = por %p414_p12, %p413_p11 }
 0x1c9   :  { %v158_v8 = vadd.f32 %v157_v5, %v152_v4  ;;  %p416_p0 = pnand %p415_p13, %p409_p10 }
 0x1cb   :  { %v164_v13 = vadd.f32 %v163_v9, %v158_v8  ;;  %v238_v8 = vld [vmem:[#allocation5 + $0x10] sm:$0xf] }
 0x1cd   :  { %v177_v17 = vadd.f32 %v176_v11, %v164_v13 }
 0x1cf   :  { %v183_v20 = vadd.f32 %v182_v15, %v177_v17  ;;  %v240_v17 = vld [vmem:[#allocation5 + $0x18] sm:$0xf] }
 0x1d1   :  { %v189_v22 = vadd.f32 %v188_v19, %v183_v20 }
 0x1d3   :  { %v195_v23 = vadd.f32 %v194_v21, %v189_v22  ;;  %v241_v21 = vld [vmem:[#allocation5 + $0x1c] sm:$0xf] }
 0x1d5   :  { %v202_v25 = vadd.f32 %v200_v24, %v195_v23 }
 0x1d7   :  { %v203_v26 = vsel %vm65_vm0, %v202_v25, 0.0  ;;  %v206_v27 = vmul.f32 %v202_v25, %v202_v25 }
 0x1d8   :  { %204 = vadd.xlane.f32.xlu1 %v203_v26 }
 0x1d9   :  { %v207_v29 = vsel %vm65_vm0, %v206_v27, 0.0 }
 0x1da   :  { %208 = vadd.xlane.f32.xlu0 %v207_v29 }
 0x261   :  { %v205_v30 = vpop.xlane.xlu1 %204 }
 0x262   :  { %v210_v34 = vmul.f32 0.03125, %v205_v30  ;;  %v243_v30 = vld [vmem:[#allocation5 + $0x24] sm:$0xf] }
 0x263   :  { %v209_v35 = vpop.xlane.xlu0 %208 }
 0x264   :  { %v212_v36 = vmul.f32 %v210_v34, %v210_v34  ;;  %v211_v38 = vmul.f32 0.03125, %v209_v35 }
 0x266   :  { %v213_v39 = vsub.f32 %v211_v38, %v212_v36  ;;  %v244_v36 = vld [vmem:[#allocation5 + $0x28] sm:$0xf] }
 0x268   :  { %v215_v40 = vadd.f32 1e-05, %v213_v39 }
 0x26a   :  { %366 = vrsqrt.f32 %v215_v40 }
 0x277   :  { %v367_v42 = vpop.eup %366 }
 0x278   :  { %v217_v43 = vmul.f32 %v367_v42, %v214_v41  ;;  %v245_v41 = vld [vmem:[#allocation5 + $0x2c] sm:$0xf] }
 0x27a   :  { %223 = vperm.xlu1 %362, %v217_v43   ;;  %v219_v45 = vmul.f32 %v217_v43, %v210_v34 }
 0x27c   :  { %v220_v46 = vsub.f32 %v218_v44, %v219_v45 }
 0x27e   :  { %229 = vperm.xlu0 %363, %v220_v46  }
 0x2f5   :  { %v224_v47 = vpop.permute.xlu1 %223 }
 0x2f6   :  { %v226_v48 = vmul.f32 %v224_v47, %v202_v25  ;;  %v242_v25 = vld [vmem:[#allocation5 + $0x20] sm:$0xf] }
 0x2f9   :  { %v230_v49 = vpop.permute.xlu0 %229 }
 0x2fa   :  { %v232_v51 = vadd.f32 %v230_v49, %v226_v48 }
 0x2fc   :  { %v233_v52 = vmax.f32 %v232_v51, 0.0 }
 0x2fe   :  { %247 = vrot.lane.b32.xlu1 %v233_v52, %s440_s1  ;;  %v279_v7 = vrot.slane %v233_v52, %v525_v31  ;;  %v285_v10 = vrot.slane %v233_v52, %v527_v32  ;;  %v291_v15 = vrot.slane %v233_v52, %v529_v33  ;;  %v297_v20 = vrot.slane %v233_v52, %v533_v37 }
 0x300   :  { %v280_v14 = vmul.f32 %v279_v7, %v238_v8  ;;  %v286_v19 = vmul.f32 %v285_v10, %v239_v12  ;;  %v292_v24 = vmul.f32 %v291_v15, %v240_v17  ;;  %v298_v29 = vmul.f32 %v297_v20, %v241_v21 }
 0x302   :  { %300 = vrot.lane.b32.xlu1 %v233_v52, %s439_s24 }
 0x306   :  { %332 = vperm.xlu1 %362, %v329_v53  }
 0x370   :  { %v248_v54 = vpop.permute.xlu1 %247 }
 0x371   :  { %v250_v55 = vsel %vm113_vm1, 0.0, %v248_v54 }
 0x372   :  { %v251_v58 = vsel %vm520_vm2, %v250_v55, 0.0 }
 0x373   :  { %v255_v59 = vrot.slane %v251_v58, %v525_v31  ;;  %v261_v60 = vrot.slane %v251_v58, %v527_v32  ;;  %v267_v61 = vrot.slane %v251_v58, %v529_v33  ;;  %v273_v2 = vrot.slane %v251_v58, %v533_v37 }
 0x374   :  { %v301_v4 = vpop.permute.xlu1 %300 }
 0x375   :  { %v256_v63 = vmul.f32 %v255_v59, %v234_v56  ;;  %v262_v1 = vmul.f32 %v261_v60, %v235_v57  ;;  %v268_v6 = vmul.f32 %v267_v61, %v236_v62  ;;  %v274_v9 = vmul.f32 %v273_v2, %v237_v3 }
 0x376   :  { %v303_v11 = vsel %vm168_vm3, %v301_v4, 0.0 }
 0x377   :  { %v263_v5 = vadd.f32 %v262_v1, %v256_v63  ;;  %v304_v16 = vsel %vm540_vm4, %v303_v11, 0.0 }
 0x378   :  { %v308_v23 = vrot.slane %v304_v16, %v525_v31  ;;  %v314_v26 = vrot.slane %v304_v16, %v527_v32  ;;  %v320_v50 = vrot.slane %v304_v16, %v529_v33  ;;  %v326_v39 = vrot.slane %v304_v16, %v533_v37 }
 0x379   :  { %v269_v28 = vadd.f32 %v268_v6, %v263_v5 }
 0x37a   :  { %v309_v34 = vmul.f32 %v308_v23, %v242_v25  ;;  %v315_v38 = vmul.f32 %v314_v26, %v243_v30  ;;  %v321_v42 = vmul.f32 %v320_v50, %v244_v36  ;;  %v327_v31 = vmul.f32 %v326_v39, %v245_v41 }
 0x37b   :  { %v275_v13 = vadd.f32 %v274_v9, %v269_v28 }
 0x37d   :  { %v281_v18 = vadd.f32 %v280_v14, %v275_v13 }
 0x37f   :  { %v287_v22 = vadd.f32 %v286_v19, %v281_v18 }
 0x381   :  { %v293_v27 = vadd.f32 %v292_v24, %v287_v22  ;;  %v333_v46 = vpop.permute.xlu1 %332 }
 0x383   :  { %v299_v35 = vadd.f32 %v298_v29, %v293_v27 }
 0x385   :  { %v310_v40 = vadd.f32 %v309_v34, %v299_v35 }
 0x387   :  { %v316_v43 = vadd.f32 %v315_v38, %v310_v40 }
 0x389   :  { %v322_v44 = vadd.f32 %v321_v42, %v316_v43 }
 0x38b   :  { %v328_v45 = vadd.f32 %v327_v31, %v322_v44 }
 0x38d   :  { %v335_v32 = vadd.f32 %v333_v46, %v328_v45 }
 0x38f   :  { %v336_v47 = vadd.f32 %v335_v32, %v501_v0 }
 0x391   :  { %337 = vst.msk [vmem:[#allocation7] sm:$0xf] %vm65_vm0, %v336_v47 }
 0x392   :  { %419 = shalt.err (!%p416_p0)
}
 0x393   :  { %347 = dma.vmem_to_hbm [thread:$0]  %s345_s8, 64, %s599_s9, [#allocation4]  }
 0x394   :  { %432 = dma.done.wait [#allocation4], 64  }
 0x395   :  { %433 = vsyncadd [#allocation4], 4294967232 }
 0x396   :  { %351 = vsyncpa [#allocation3], 1 }
 0x397   :  { %352 = vsyncpa [#allocation6], 1 }
 0x398   :  { %353 = vsyncpa [#allocation4], 1 }

</bundles_post_ra>
